<compile_context>
chip_gen: v7x
topology: tpu7x:2x2x1
jax: 0.10.0
libtpu: 0.0.40
codegen_flags: <defaults>
</compile_context>

<pallas_src>
import jax
import jax.numpy as jnp
from jax.experimental import pallas as pl
from jax.experimental.pallas import tpu as pltpu


def _round_up(x, m):
    return ((x + m - 1) // m) * m


def _choose_tm(n):
    m8 = _round_up(max(n, 1), 8)
    if m8 <= 8:
        return 8
    if m8 <= 64:
        # >= 2 grid rows so both v7x TensorCores get work for small n.
        return _round_up((m8 + 1) // 2, 8)
    # Pick the tile (multiple of 8, <= 64) that minimizes padded rows.
    cands = (64, 56, 48, 40)
    return min(cands, key=lambda t: (_round_up(m8, t), -t))


def _choose_tn(n):
    l128 = _round_up(max(n, 1), 128)
    return 256 if (l128 % 256 == 0 and l128 >= 256) else 128


def edge_mlp_kernel(split_ref, b2_ref, a3_ref, bt_ref, out_ref):
    """split_ref: (1,) int32 SMEM -- number of 'add' chunks (w2 >= 0 group).
    b2_ref: (1,) f32 SMEM.
    a3_ref: (n_chunks, tm, 8) VMEM, a3[c, i, u] = |w2|*A[i, 8c+u].
    bt_ref: (hid_pad, tn) VMEM,   bt[k, j]     = |w2|*B[j, k].
    out_ref: (tm, tn) f32 logits tile."""
    tm, tn = out_ref.shape
    n_chunks = a3_ref.shape[0]
    ch = a3_ref.shape[2]

    # fc2 bias folded into the accumulator init (accumulate in the out block;
    # per-chunk reload/store is ~16 ld/st vs ~300+ VALU ops -> fully hidden).
    out_ref[...] = jnp.full((tm, tn), b2_ref[0], dtype=jnp.float32)
    split = split_ref[0]

    def accumulate(c, sign):
        k0 = pl.multiple_of(c * ch, ch)
        b_chunk = bt_ref[pl.ds(k0, ch), :]            # (ch, tn), j on lanes
        acc = out_ref[...]
        for u in range(ch):                           # static inner unroll
            a_col = a3_ref[c, :, u:u + 1]             # (tm, 1), i on sublanes
            r = jnp.maximum(a_col + b_chunk[u:u + 1, :], 0.0)
            acc = acc + r if sign > 0 else acc - r
        out_ref[...] = acc

    @pl.loop(0, split)
    def _pos(c):
        accumulate(c, +1)

    @pl.loop(split, n_chunks)
    def _neg(c):
        accumulate(c, -1)


def edge_mlp_pallas(z, w1, b1, w2, b2, *, tm=None, tn=None):
    """z: (n, z_dim) f32.  w1: (2*z_dim, hid) (transposed vs torch), b1: (hid,),
    w2: (hid,), b2: ().  Returns (n, n) f32 logits."""
    n, z_dim = z.shape
    hid = w1.shape[1]
    assert w1.shape == (2 * z_dim, hid)

    f32 = jnp.float32
    z = z.astype(f32)
    w1 = jnp.asarray(w1, f32)
    b1 = jnp.asarray(b1, f32)
    w2f = jnp.asarray(w2, f32).reshape(hid)
    b2f = jnp.asarray(b2, f32).reshape(-1)[:1]        # (1,)

    # --- fc1 hoisted out of the pairwise grid (plain XLA matmuls, run once) ---
    hi = jax.lax.Precision.HIGHEST
    a = jnp.dot(z, w1[:z_dim], precision=hi) + b1     # (n, hid)
    b = jnp.dot(z, w1[z_dim:], precision=hi)          # (n, hid)

    # --- sign-split + |w2| folding: non-negative channels first, both sides
    #     scaled by |w2|; per-channel multiply disappears from the kernel. ---
    neg = w2f < 0
    order = jnp.argsort(neg.astype(jnp.int32))        # w2 >= 0 channels first
    scale = jnp.abs(w2f[order])
    ao = a[:, order] * scale                          # (n, hid)
    bo = b[:, order] * scale
    n_pos = jnp.sum(jnp.logical_not(neg)).astype(jnp.int32)

    CH = 8
    hid_pad = _round_up(hid, CH) + CH                 # room to 8-align the split
    n_chunks = hid_pad // CH
    n_pos_pad = ((n_pos + CH - 1) // CH) * CH
    t = jnp.arange(hid, dtype=jnp.int32)
    dest = jnp.where(t < n_pos, t, t + (n_pos_pad - n_pos))
    # Zero-padded channels contribute relu(0)=0 in either group.
    A = jnp.zeros((n, hid_pad), f32).at[:, dest].set(ao)
    B = jnp.zeros((n, hid_pad), f32).at[:, dest].set(bo)
    split = (n_pos_pad // CH).astype(jnp.int32).reshape(1)

    # --- lane-dense tiling ---
    if tm is None:
        tm = _choose_tm(n)
    if tn is None:
        tn = _choose_tn(n)
    assert tm % 8 == 0 and tn % 128 == 0

    n_pad_m = _round_up(n, tm)
    n_pad_n = _round_up(n, tn)

    # A3[c, i, u] = A[i, CH*c + u] -> dynamic indexing in the kernel only ever
    # hits the leading dim / sublanes, never the lane dimension.
    A3 = jnp.pad(A, ((0, n_pad_m - n), (0, 0)))
    A3 = A3.reshape(n_pad_m, n_chunks, CH).transpose(1, 0, 2)   # (C, n_pad_m, 8)
    Bt = jnp.pad(B.T, ((0, 0), (0, n_pad_n - n)))               # (hid_pad, n_pad_n)

    grid = (n_pad_m // tm, n_pad_n // tn)

    out = pl.pallas_call(
        edge_mlp_kernel,
        out_shape=jax.ShapeDtypeStruct((n_pad_m, n_pad_n), f32),
        grid_spec=pltpu.PrefetchScalarGridSpec(
            num_scalar_prefetch=0,
            grid=grid,
            in_specs=[
                pl.BlockSpec(memory_space=pltpu.MemorySpace.SMEM),   # split (1,)
                pl.BlockSpec(memory_space=pltpu.MemorySpace.SMEM),   # b2 (1,)
                pl.BlockSpec((n_chunks, tm, CH), lambda i, j: (0, i, 0)),  # A3
                pl.BlockSpec((hid_pad, tn), lambda i, j: (0, j)),          # Bt
            ],
            out_specs=pl.BlockSpec((tm, tn), lambda i, j: (i, j)),
        ),
        compiler_params=pltpu.CompilerParams(
            dimension_semantics=("parallel", "parallel")),
    )(split, b2f, A3, Bt)

    # Padded rows/cols hold garbage but never contaminate valid outputs
    # (no reduction crosses i or j); slice them off.
    return out[:n, :n]


def edge_mlp_ref(z, w1, b1, w2, b2):
    n = z.shape[0]
    hi = jax.lax.Precision.HIGHEST
    zi = jnp.broadcast_to(z[:, None, :], (n, n, z.shape[1]))
    zj = jnp.broadcast_to(z[None, :, :], (n, n, z.shape[1]))
    pair = jnp.concatenate([zi, zj], axis=-1)
    h = jax.nn.relu(jnp.dot(pair, w1, precision=hi) + b1)
    return (jnp.dot(h, w2[:, None], precision=hi) + b2)[..., 0]


if __name__ == "__main__":
    key = jax.random.PRNGKey(0)
    z_dim, hid = 16, 128

    # n=8: single tiny tile; n=200: multi-tile grid with row/col padding.
    for n in (8, 200):
        k_z, k_w1, k_b1, k_w2, k_b2 = jax.random.split(jax.random.fold_in(key, n), 5)
        # nn.Linear-style uniform(-1/sqrt(fan_in), 1/sqrt(fan_in)) init.
        bound1 = 1.0 / jnp.sqrt(2.0 * z_dim)
        bound2 = 1.0 / jnp.sqrt(float(hid))
        z = jax.random.normal(k_z, (n, z_dim), dtype=jnp.float32)
        w1 = jax.random.uniform(k_w1, (2 * z_dim, hid), jnp.float32, -bound1, bound1)
        b1 = jax.random.uniform(k_b1, (hid,), jnp.float32, -bound1, bound1)
        w2 = jax.random.uniform(k_w2, (hid,), jnp.float32, -bound2, bound2)
        b2 = jax.random.uniform(k_b2, (), jnp.float32, -bound2, bound2)

        logits = edge_mlp_pallas(z, w1, b1, w2, b2)
        jax.block_until_ready(logits)

        ref = edge_mlp_ref(z, w1, b1, w2, b2)
        assert logits.shape == (n, n)
        err = float(jnp.max(jnp.abs(logits - ref)))
        assert err < 2e-4, (n, err)

    print("KERNEL_OK")
</pallas_src>

<mosaic_0001>
module attributes {stable_mosaic.version = 11 : i64} {
  func.func @edge_mlp_kernel(%arg0: i32, %arg1: i32, %arg2: memref<1xi32, #tpu.memory_space<smem>>, %arg3: memref<1xf32, #tpu.memory_space<smem>>, %arg4: memref<17x8x8xf32, #tpu.memory_space<vmem>>, %arg5: memref<136x128xf32, #tpu.memory_space<vmem>>, %arg6: memref<8x128xf32, #tpu.memory_space<vmem>>) attributes {dimension_semantics = [#tpu.dimension_semantics<parallel>, #tpu.dimension_semantics<parallel>], iteration_bounds = array<i64: 1, 1>, scalar_prefetch = 0 : i64, scratch_operands = 0 : i64, tpu.core_type = #tpu.core_type<tc>, window_params = [{transform_indices = @transform_0, window_bounds = array<i64: 1>}, {transform_indices = @transform_1, window_bounds = array<i64: 1>}, {transform_indices = @transform_2, window_bounds = array<i64: 17, 8, 8>}, {transform_indices = @transform_3, window_bounds = array<i64: 136, 128>}, {transform_indices = @transform_4, window_bounds = array<i64: 8, 128>}]} {
    %c0 = arith.constant 0 : index
    %0 = memref.load %arg3[%c0] : memref<1xf32, #tpu.memory_space<smem>>
    %1 = vector.broadcast %0 : f32 to vector<8x128xf32>
    %c0_0 = arith.constant 0 : index
    %c0_1 = arith.constant 0 : index
    %2 = vector.load %arg6[%c0_0, %c0_1] : memref<8x128xf32, #tpu.memory_space<vmem>>, vector<8x128xf32>
    tpu.vector_store %arg6[%c0_0, %c0_1], %1 {strides = array<i32>} : memref<8x128xf32, #tpu.memory_space<vmem>>, vector<8x128xf32>,
    %c0_2 = arith.constant 0 : index
    %3 = memref.load %arg2[%c0_2] : memref<1xi32, #tpu.memory_space<smem>>
    %c0_i32 = arith.constant 0 : i32
    %4 = arith.subi %3, %c0_i32 : i32
    %c1_i32 = arith.constant 1 : i32
    %c1_i32_3 = arith.constant 1 : i32
    %5 = arith.subi %c1_i32, %c1_i32_3 : i32
    %6 = arith.addi %4, %5 : i32
    %c1_i32_4 = arith.constant 1 : i32
    %7 = arith.divsi %6, %c1_i32_4 : i32
    %c1_i32_5 = arith.constant 1 : i32
    %c0_i32_6 = arith.constant 0 : i32
    %c0_i32_7 = arith.constant 0 : i32
    %8 = arith.subi %7, %c0_i32_7 : i32
    %9 = arith.addi %c0_i32_7, %8 : i32
    %c1_i32_8 = arith.constant 1 : i32
    scf.for %arg7 = %c0_i32_7 to %9 step %c1_i32_8  : i32 {
      %16 = arith.muli %arg7, %c1_i32_5 : i32
      %17 = arith.addi %c0_i32_6, %16 : i32
      %c8_i32 = arith.constant 8 : i32
      %18 = arith.muli %17, %c8_i32 : i32
      %19 = tpu.assume_multiple %18, 8 : i32
      %20 = arith.index_cast %19 : i32 to index
      %c0_15 = arith.constant 0 : index
      %21 = vector.load %arg5[%20, %c0_15] : memref<136x128xf32, #tpu.memory_space<vmem>>, vector<8x128xf32>
      %c0_16 = arith.constant 0 : index
      %c0_17 = arith.constant 0 : index
      %22 = vector.load %arg6[%c0_16, %c0_17] : memref<8x128xf32, #tpu.memory_space<vmem>>, vector<8x128xf32>
      %23 = arith.index_cast %17 : i32 to index
      %c0_18 = arith.constant 0 : index
      %c0_19 = arith.constant 0 : index
      %24 = vector.load %arg4[%23, %c0_18, %c0_19] : memref<17x8x8xf32, #tpu.memory_space<vmem>>, vector<1x8x1xf32>
      %25 = vector.shape_cast %24 : vector<1x8x1xf32> to vector<8x1xf32>
      %26 = vector.extract_strided_slice %21 {offsets = [0, 0], sizes = [1, 128], strides = [1, 1]} : vector<8x128xf32> to vector<1x128xf32>
      %27 = vector.broadcast %25 : vector<8x1xf32> to vector<8x128xf32>
      %28 = vector.broadcast %26 : vector<1x128xf32> to vector<8x128xf32>
      %29 = arith.addf %27, %28 : vector<8x128xf32>
      %cst = arith.constant 0.000000e+00 : f32
      %30 = vector.broadcast %cst : f32 to vector<8x128xf32>
      %31 = arith.maximumf %29, %30 : vector<8x128xf32>
      %32 = arith.addf %22, %31 : vector<8x128xf32>
      %33 = arith.index_cast %17 : i32 to index
      %c0_20 = arith.constant 0 : index
      %c1 = arith.constant 1 : index
      %34 = vector.load %arg4[%33, %c0_20, %c1] : memref<17x8x8xf32, #tpu.memory_space<vmem>>, vector<1x8x1xf32>
      %35 = vector.shape_cast %34 : vector<1x8x1xf32> to vector<8x1xf32>
      %36 = vector.extract_strided_slice %21 {offsets = [1, 0], sizes = [1, 128], strides = [1, 1]} : vector<8x128xf32> to vector<1x128xf32>
      %37 = vector.broadcast %35 : vector<8x1xf32> to vector<8x128xf32>
      %38 = vector.broadcast %36 : vector<1x128xf32> to vector<8x128xf32>
      %39 = arith.addf %37, %38 : vector<8x128xf32>
      %cst_21 = arith.constant 0.000000e+00 : f32
      %40 = vector.broadcast %cst_21 : f32 to vector<8x128xf32>
      %41 = arith.maximumf %39, %40 : vector<8x128xf32>
      %42 = arith.addf %32, %41 : vector<8x128xf32>
      %43 = arith.index_cast %17 : i32 to index
      %c0_22 = arith.constant 0 : index
      %c2 = arith.constant 2 : index
      %44 = vector.load %arg4[%43, %c0_22, %c2] : memref<17x8x8xf32, #tpu.memory_space<vmem>>, vector<1x8x1xf32>
      %45 = vector.shape_cast %44 : vector<1x8x1xf32> to vector<8x1xf32>
      %46 = vector.extract_strided_slice %21 {offsets = [2, 0], sizes = [1, 128], strides = [1, 1]} : vector<8x128xf32> to vector<1x128xf32>
      %47 = vector.broadcast %45 : vector<8x1xf32> to vector<8x128xf32>
      %48 = vector.broadcast %46 : vector<1x128xf32> to vector<8x128xf32>
      %49 = arith.addf %47, %48 : vector<8x128xf32>
      %cst_23 = arith.constant 0.000000e+00 : f32
      %50 = vector.broadcast %cst_23 : f32 to vector<8x128xf32>
      %51 = arith.maximumf %49, %50 : vector<8x128xf32>
      %52 = arith.addf %42, %51 : vector<8x128xf32>
      %53 = arith.index_cast %17 : i32 to index
      %c0_24 = arith.constant 0 : index
      %c3 = arith.constant 3 : index
      %54 = vector.load %arg4[%53, %c0_24, %c3] : memref<17x8x8xf32, #tpu.memory_space<vmem>>, vector<1x8x1xf32>
      %55 = vector.shape_cast %54 : vector<1x8x1xf32> to vector<8x1xf32>
      %56 = vector.extract_strided_slice %21 {offsets = [3, 0], sizes = [1, 128], strides = [1, 1]} : vector<8x128xf32> to vector<1x128xf32>
      %57 = vector.broadcast %55 : vector<8x1xf32> to vector<8x128xf32>
      %58 = vector.broadcast %56 : vector<1x128xf32> to vector<8x128xf32>
      %59 = arith.addf %57, %58 : vector<8x128xf32>
      %cst_25 = arith.constant 0.000000e+00 : f32
      %60 = vector.broadcast %cst_25 : f32 to vector<8x128xf32>
      %61 = arith.maximumf %59, %60 : vector<8x128xf32>
      %62 = arith.addf %52, %61 : vector<8x128xf32>
      %63 = arith.index_cast %17 : i32 to index
      %c0_26 = arith.constant 0 : index
      %c4 = arith.constant 4 : index
      %64 = vector.load %arg4[%63, %c0_26, %c4] : memref<17x8x8xf32, #tpu.memory_space<vmem>>, vector<1x8x1xf32>
      %65 = vector.shape_cast %64 : vector<1x8x1xf32> to vector<8x1xf32>
      %66 = vector.extract_strided_slice %21 {offsets = [4, 0], sizes = [1, 128], strides = [1, 1]} : vector<8x128xf32> to vector<1x128xf32>
      %67 = vector.broadcast %65 : vector<8x1xf32> to vector<8x128xf32>
      %68 = vector.broadcast %66 : vector<1x128xf32> to vector<8x128xf32>
      %69 = arith.addf %67, %68 : vector<8x128xf32>
      %cst_27 = arith.constant 0.000000e+00 : f32
      %70 = vector.broadcast %cst_27 : f32 to vector<8x128xf32>
      %71 = arith.maximumf %69, %70 : vector<8x128xf32>
      %72 = arith.addf %62, %71 : vector<8x128xf32>
      %73 = arith.index_cast %17 : i32 to index
      %c0_28 = arith.constant 0 : index
      %c5 = arith.constant 5 : index
      %74 = vector.load %arg4[%73, %c0_28, %c5] : memref<17x8x8xf32, #tpu.memory_space<vmem>>, vector<1x8x1xf32>
      %75 = vector.shape_cast %74 : vector<1x8x1xf32> to vector<8x1xf32>
      %76 = vector.extract_strided_slice %21 {offsets = [5, 0], sizes = [1, 128], strides = [1, 1]} : vector<8x128xf32> to vector<1x128xf32>
      %77 = vector.broadcast %75 : vector<8x1xf32> to vector<8x128xf32>
      %78 = vector.broadcast %76 : vector<1x128xf32> to vector<8x128xf32>
      %79 = arith.addf %77, %78 : vector<8x128xf32>
      %cst_29 = arith.constant 0.000000e+00 : f32
      %80 = vector.broadcast %cst_29 : f32 to vector<8x128xf32>
      %81 = arith.maximumf %79, %80 : vector<8x128xf32>
      %82 = arith.addf %72, %81 : vector<8x128xf32>
      %83 = arith.index_cast %17 : i32 to index
      %c0_30 = arith.constant 0 : index
      %c6 = arith.constant 6 : index
      %84 = vector.load %arg4[%83, %c0_30, %c6] : memref<17x8x8xf32, #tpu.memory_space<vmem>>, vector<1x8x1xf32>
      %85 = vector.shape_cast %84 : vector<1x8x1xf32> to vector<8x1xf32>
      %86 = vector.extract_strided_slice %21 {offsets = [6, 0], sizes = [1, 128], strides = [1, 1]} : vector<8x128xf32> to vector<1x128xf32>
      %87 = vector.broadcast %85 : vector<8x1xf32> to vector<8x128xf32>
      %88 = vector.broadcast %86 : vector<1x128xf32> to vector<8x128xf32>
      %89 = arith.addf %87, %88 : vector<8x128xf32>
      %cst_31 = arith.constant 0.000000e+00 : f32
      %90 = vector.broadcast %cst_31 : f32 to vector<8x128xf32>
      %91 = arith.maximumf %89, %90 : vector<8x128xf32>
      %92 = arith.addf %82, %91 : vector<8x128xf32>
      %93 = arith.index_cast %17 : i32 to index
      %c0_32 = arith.constant 0 : index
      %c7 = arith.constant 7 : index
      %94 = vector.load %arg4[%93, %c0_32, %c7] : memref<17x8x8xf32, #tpu.memory_space<vmem>>, vector<1x8x1xf32>
      %95 = vector.shape_cast %94 : vector<1x8x1xf32> to vector<8x1xf32>
      %96 = vector.extract_strided_slice %21 {offsets = [7, 0], sizes = [1, 128], strides = [1, 1]} : vector<8x128xf32> to vector<1x128xf32>
      %97 = vector.broadcast %95 : vector<8x1xf32> to vector<8x128xf32>
      %98 = vector.broadcast %96 : vector<1x128xf32> to vector<8x128xf32>
      %99 = arith.addf %97, %98 : vector<8x128xf32>
      %cst_33 = arith.constant 0.000000e+00 : f32
      %100 = vector.broadcast %cst_33 : f32 to vector<8x128xf32>
      %101 = arith.maximumf %99, %100 : vector<8x128xf32>
      %102 = arith.addf %92, %101 : vector<8x128xf32>
      %c0_34 = arith.constant 0 : index
      %c0_35 = arith.constant 0 : index
      %103 = vector.load %arg6[%c0_34, %c0_35] : memref<8x128xf32, #tpu.memory_space<vmem>>, vector<8x128xf32>
      tpu.vector_store %arg6[%c0_34, %c0_35], %102 {strides = array<i32>} : memref<8x128xf32, #tpu.memory_space<vmem>>, vector<8x128xf32>,
    }
    %c17_i32 = arith.constant 17 : i32
    %10 = arith.subi %c17_i32, %3 : i32
    %c1_i32_9 = arith.constant 1 : i32
    %c1_i32_10 = arith.constant 1 : i32
    %11 = arith.subi %c1_i32_9, %c1_i32_10 : i32
    %12 = arith.addi %10, %11 : i32
    %c1_i32_11 = arith.constant 1 : i32
    %13 = arith.divsi %12, %c1_i32_11 : i32
    %c1_i32_12 = arith.constant 1 : i32
    %c0_i32_13 = arith.constant 0 : i32
    %14 = arith.subi %13, %c0_i32_13 : i32
    %15 = arith.addi %c0_i32_13, %14 : i32
    %c1_i32_14 = arith.constant 1 : i32
    scf.for %arg7 = %c0_i32_13 to %15 step %c1_i32_14  : i32 {
      %16 = arith.muli %arg7, %c1_i32_12 : i32
      %17 = arith.addi %3, %16 : i32
      %c8_i32 = arith.constant 8 : i32
      %18 = arith.muli %17, %c8_i32 : i32
      %19 = tpu.assume_multiple %18, 8 : i32
      %20 = arith.index_cast %19 : i32 to index
      %c0_15 = arith.constant 0 : index
      %21 = vector.load %arg5[%20, %c0_15] : memref<136x128xf32, #tpu.memory_space<vmem>>, vector<8x128xf32>
      %c0_16 = arith.constant 0 : index
      %c0_17 = arith.constant 0 : index
      %22 = vector.load %arg6[%c0_16, %c0_17] : memref<8x128xf32, #tpu.memory_space<vmem>>, vector<8x128xf32>
      %23 = arith.index_cast %17 : i32 to index
      %c0_18 = arith.constant 0 : index
      %c0_19 = arith.constant 0 : index
      %24 = vector.load %arg4[%23, %c0_18, %c0_19] : memref<17x8x8xf32, #tpu.memory_space<vmem>>, vector<1x8x1xf32>
      %25 = vector.shape_cast %24 : vector<1x8x1xf32> to vector<8x1xf32>
      %26 = vector.extract_strided_slice %21 {offsets = [0, 0], sizes = [1, 128], strides = [1, 1]} : vector<8x128xf32> to vector<1x128xf32>
      %27 = vector.broadcast %25 : vector<8x1xf32> to vector<8x128xf32>
      %28 = vector.broadcast %26 : vector<1x128xf32> to vector<8x128xf32>
      %29 = arith.addf %27, %28 : vector<8x128xf32>
      %cst = arith.constant 0.000000e+00 : f32
      %30 = vector.broadcast %cst : f32 to vector<8x128xf32>
      %31 = arith.maximumf %29, %30 : vector<8x128xf32>
      %32 = arith.subf %22, %31 : vector<8x128xf32>
      %33 = arith.index_cast %17 : i32 to index
      %c0_20 = arith.constant 0 : index
      %c1 = arith.constant 1 : index
      %34 = vector.load %arg4[%33, %c0_20, %c1] : memref<17x8x8xf32, #tpu.memory_space<vmem>>, vector<1x8x1xf32>
      %35 = vector.shape_cast %34 : vector<1x8x1xf32> to vector<8x1xf32>
      %36 = vector.extract_strided_slice %21 {offsets = [1, 0], sizes = [1, 128], strides = [1, 1]} : vector<8x128xf32> to vector<1x128xf32>
      %37 = vector.broadcast %35 : vector<8x1xf32> to vector<8x128xf32>
      %38 = vector.broadcast %36 : vector<1x128xf32> to vector<8x128xf32>
      %39 = arith.addf %37, %38 : vector<8x128xf32>
      %cst_21 = arith.constant 0.000000e+00 : f32
      %40 = vector.broadcast %cst_21 : f32 to vector<8x128xf32>
      %41 = arith.maximumf %39, %40 : vector<8x128xf32>
      %42 = arith.subf %32, %41 : vector<8x128xf32>
      %43 = arith.index_cast %17 : i32 to index
      %c0_22 = arith.constant 0 : index
      %c2 = arith.constant 2 : index
      %44 = vector.load %arg4[%43, %c0_22, %c2] : memref<17x8x8xf32, #tpu.memory_space<vmem>>, vector<1x8x1xf32>
      %45 = vector.shape_cast %44 : vector<1x8x1xf32> to vector<8x1xf32>
      %46 = vector.extract_strided_slice %21 {offsets = [2, 0], sizes = [1, 128], strides = [1, 1]} : vector<8x128xf32> to vector<1x128xf32>
      %47 = vector.broadcast %45 : vector<8x1xf32> to vector<8x128xf32>
      %48 = vector.broadcast %46 : vector<1x128xf32> to vector<8x128xf32>
      %49 = arith.addf %47, %48 : vector<8x128xf32>
      %cst_23 = arith.constant 0.000000e+00 : f32
      %50 = vector.broadcast %cst_23 : f32 to vector<8x128xf32>
      %51 = arith.maximumf %49, %50 : vector<8x128xf32>
      %52 = arith.subf %42, %51 : vector<8x128xf32>
      %53 = arith.index_cast %17 : i32 to index
      %c0_24 = arith.constant 0 : index
      %c3 = arith.constant 3 : index
      %54 = vector.load %arg4[%53, %c0_24, %c3] : memref<17x8x8xf32, #tpu.memory_space<vmem>>, vector<1x8x1xf32>
      %55 = vector.shape_cast %54 : vector<1x8x1xf32> to vector<8x1xf32>
      %56 = vector.extract_strided_slice %21 {offsets = [3, 0], sizes = [1, 128], strides = [1, 1]} : vector<8x128xf32> to vector<1x128xf32>
      %57 = vector.broadcast %55 : vector<8x1xf32> to vector<8x128xf32>
      %58 = vector.broadcast %56 : vector<1x128xf32> to vector<8x128xf32>
      %59 = arith.addf %57, %58 : vector<8x128xf32>
      %cst_25 = arith.constant 0.000000e+00 : f32
      %60 = vector.broadcast %cst_25 : f32 to vector<8x128xf32>
      %61 = arith.maximumf %59, %60 : vector<8x128xf32>
      %62 = arith.subf %52, %61 : vector<8x128xf32>
      %63 = arith.index_cast %17 : i32 to index
      %c0_26 = arith.constant 0 : index
      %c4 = arith.constant 4 : index
      %64 = vector.load %arg4[%63, %c0_26, %c4] : memref<17x8x8xf32, #tpu.memory_space<vmem>>, vector<1x8x1xf32>
      %65 = vector.shape_cast %64 : vector<1x8x1xf32> to vector<8x1xf32>
      %66 = vector.extract_strided_slice %21 {offsets = [4, 0], sizes = [1, 128], strides = [1, 1]} : vector<8x128xf32> to vector<1x128xf32>
      %67 = vector.broadcast %65 : vector<8x1xf32> to vector<8x128xf32>
      %68 = vector.broadcast %66 : vector<1x128xf32> to vector<8x128xf32>
      %69 = arith.addf %67, %68 : vector<8x128xf32>
      %cst_27 = arith.constant 0.000000e+00 : f32
      %70 = vector.broadcast %cst_27 : f32 to vector<8x128xf32>
      %71 = arith.maximumf %69, %70 : vector<8x128xf32>
      %72 = arith.subf %62, %71 : vector<8x128xf32>
      %73 = arith.index_cast %17 : i32 to index
      %c0_28 = arith.constant 0 : index
      %c5 = arith.constant 5 : index
      %74 = vector.load %arg4[%73, %c0_28, %c5] : memref<17x8x8xf32, #tpu.memory_space<vmem>>, vector<1x8x1xf32>
      %75 = vector.shape_cast %74 : vector<1x8x1xf32> to vector<8x1xf32>
      %76 = vector.extract_strided_slice %21 {offsets = [5, 0], sizes = [1, 128], strides = [1, 1]} : vector<8x128xf32> to vector<1x128xf32>
      %77 = vector.broadcast %75 : vector<8x1xf32> to vector<8x128xf32>
      %78 = vector.broadcast %76 : vector<1x128xf32> to vector<8x128xf32>
      %79 = arith.addf %77, %78 : vector<8x128xf32>
      %cst_29 = arith.constant 0.000000e+00 : f32
      %80 = vector.broadcast %cst_29 : f32 to vector<8x128xf32>
      %81 = arith.maximumf %79, %80 : vector<8x128xf32>
      %82 = arith.subf %72, %81 : vector<8x128xf32>
      %83 = arith.index_cast %17 : i32 to index
      %c0_30 = arith.constant 0 : index
      %c6 = arith.constant 6 : index
      %84 = vector.load %arg4[%83, %c0_30, %c6] : memref<17x8x8xf32, #tpu.memory_space<vmem>>, vector<1x8x1xf32>
      %85 = vector.shape_cast %84 : vector<1x8x1xf32> to vector<8x1xf32>
      %86 = vector.extract_strided_slice %21 {offsets = [6, 0], sizes = [1, 128], strides = [1, 1]} : vector<8x128xf32> to vector<1x128xf32>
      %87 = vector.broadcast %85 : vector<8x1xf32> to vector<8x128xf32>
      %88 = vector.broadcast %86 : vector<1x128xf32> to vector<8x128xf32>
      %89 = arith.addf %87, %88 : vector<8x128xf32>
      %cst_31 = arith.constant 0.000000e+00 : f32
      %90 = vector.broadcast %cst_31 : f32 to vector<8x128xf32>
      %91 = arith.maximumf %89, %90 : vector<8x128xf32>
      %92 = arith.subf %82, %91 : vector<8x128xf32>
      %93 = arith.index_cast %17 : i32 to index
      %c0_32 = arith.constant 0 : index
      %c7 = arith.constant 7 : index
      %94 = vector.load %arg4[%93, %c0_32, %c7] : memref<17x8x8xf32, #tpu.memory_space<vmem>>, vector<1x8x1xf32>
      %95 = vector.shape_cast %94 : vector<1x8x1xf32> to vector<8x1xf32>
      %96 = vector.extract_strided_slice %21 {offsets = [7, 0], sizes = [1, 128], strides = [1, 1]} : vector<8x128xf32> to vector<1x128xf32>
      %97 = vector.broadcast %95 : vector<8x1xf32> to vector<8x128xf32>
      %98 = vector.broadcast %96 : vector<1x128xf32> to vector<8x128xf32>
      %99 = arith.addf %97, %98 : vector<8x128xf32>
      %cst_33 = arith.constant 0.000000e+00 : f32
      %100 = vector.broadcast %cst_33 : f32 to vector<8x128xf32>
      %101 = arith.maximumf %99, %100 : vector<8x128xf32>
      %102 = arith.subf %92, %101 : vector<8x128xf32>
      %c0_34 = arith.constant 0 : index
      %c0_35 = arith.constant 0 : index
      %103 = vector.load %arg6[%c0_34, %c0_35] : memref<8x128xf32, #tpu.memory_space<vmem>>, vector<8x128xf32>
      tpu.vector_store %arg6[%c0_34, %c0_35], %102 {strides = array<i32>} : memref<8x128xf32, #tpu.memory_space<vmem>>, vector<8x128xf32>,
    }
    return
  }
  func.func @transform_0(%arg0: i32, %arg1: i32) -> i32 {
    %c0_i32 = arith.constant 0 : i32
    %c0_i32_0 = arith.constant 0 : i32
    return %c0_i32 : i32
  }
  func.func @transform_1(%arg0: i32, %arg1: i32) -> i32 {
    %c0_i32 = arith.constant 0 : i32
    %c0_i32_0 = arith.constant 0 : i32
    return %c0_i32 : i32
  }
  func.func @transform_2(%arg0: i32, %arg1: i32) -> (i32, i32, i32) {
    %c0_i32 = arith.constant 0 : i32
    %c0_i32_0 = arith.constant 0 : i32
    %c0_i32_1 = arith.constant 0 : i32
    return %c0_i32, %arg0, %c0_i32_0 : i32, i32, i32
  }
  func.func @transform_3(%arg0: i32, %arg1: i32) -> (i32, i32) {
    %c0_i32 = arith.constant 0 : i32
    %c0_i32_0 = arith.constant 0 : i32
    return %c0_i32, %arg1 : i32, i32
  }
  func.func @transform_4(%arg0: i32, %arg1: i32) -> (i32, i32) {
    %c0_i32 = arith.constant 0 : i32
    return %arg0, %arg1 : i32, i32
  }
}

</mosaic_0001>

<bundles_post_ra>
// kernel: tpu_custom_call.1
= control target key start
LH: loop header
LB: loop body
LE: loop exit
PB: predicated region body
PF: predicated region fallthrough
CT: control target
= control target key end

     0   :  { %11 = vsyncpa [#allocation5], 0  ;;  %s466_s0 = inlined_call_operand.<no memory space> [shape: s32[1], index: 0, kind: input, shape index: {}]   ;;  %s467_s1 = inlined_call_operand.<no memory space> [shape: f32[1], index: 1, kind: input, shape index: {}]   ;;  %s468_s2 = inlined_call_operand.vmem [shape: f32[17,8,8], index: 2, kind: input, shape index: {}]   ;;  %s469_s3 = inlined_call_operand.vmem [shape: f32[136,128], index: 3, kind: input, shape index: {}]   ;;  %s470_s4 = inlined_call_operand.hbm [shape: f32[8,128], index: 4, kind: output, shape index: {}]  }
   0x1   :  { %v21_v0 = vstv %s467_s1  ;;  %p264_p0 = scmp.le.s32.totalorder %s466_s0, 0 }
   0x2   :  { %22 = vst [vmem:[#allocation4] sm:$0xff] %v21_v0  ;;  %s407_s19 = smov (!%p264_p0), 0  }
   0x3   :  { %256 = sbr.rel (%p264_p0) target bundleno = 168 (0xa8), region = 48 }
   0xa LB: > { %v359_v1 = vmov 2   ;;  %v360_v2 = vmov 0   ;;  %s265_s20 = sshll.u32 %s353_s19, 3  ;;  %v361_v4 = vmov 3   ;;  %v362_v5 = vmov 1   ;;  %v33_v23 = vld [vmem:[#allocation4] sm:$0xff]  ;;  %s353_s19 = sphi %s407_s19, %s27_s19  }
   0xb   : > { %303 = vset.pattern.permute.xlu1 %v359_v1  ;;  %301 = vset.pattern.permute.xlu0 %v360_v2  ;;  %s34_s22 = scalar_lea.vmem %s468_s2, %s265_s20  ;;  %v363_v6 = vmov 4   ;;  %v364_v7 = vmov 5   ;;  %v365_v8 = vmov 6   ;;  %v366_v9 = vmov 7   ;;  %s31_s25 = scalar_lea.vmem %s469_s3, %s265_s20 }
   0xc   : > { %v35_v3 = vld [vmem:[%s34_s22] sm:$0xff]  ;;  %v41_v10 = vlaneseq  ;;  %s27_s19 = sadd.s32 1, %s353_s19  }
   0xd   : > { %60 = vperm.xlu1 %303, %v35_v3   ;;  %38 = vperm.xlu0 %301, %v35_v3   ;;  %v32_v13 = vld [vmem:[%s31_s25] sm:$0xff]  ;;  %p26_p1 = scmp.ge.s32.totalorder %s27_s19, %s466_s0 }
   0xe   : > { %v42_v11 = vshrl.u32 %v41_v10, 7 }
  0x10   : > { %v43_v12 = vsub.s32 0, %v42_v11  ;;  %v65_v15 = vsub.s32 2, %v42_v11  ;;  %v54_v16 = vsub.s32 1, %v42_v11  ;;  %v76_v19 = vsub.s32 3, %v42_v11 }
  0x11   : > { %304 = vset.pattern.permute.xlu1 %v361_v4  ;;  %302 = vset.pattern.permute.xlu0 %v362_v5  ;;  %v87_v25 = vsub.s32 4, %v42_v11  ;;  %v98_v26 = vsub.s32 5, %v42_v11  ;;  %v109_v37 = vsub.s32 6, %v42_v11  ;;  %v120_v48 = vsub.s32 7, %v42_v11 }
  0x12   : > { %71 = vperm.xlu1 %304, %v35_v3   ;;  %49 = vperm.xlu0 %302, %v35_v3   ;;  %v44_v14 = vrot.slane %v32_v13, %v43_v12  ;;  %v66_v21 = vrot.slane %v32_v13, %v65_v15  ;;  %v55_v22 = vrot.slane %v32_v13, %v54_v16 }
  0x13   : > { %v77_v27 = vrot.slane %v32_v13, %v76_v19  ;;  %v88_v33 = vrot.slane %v32_v13, %v87_v25  ;;  %v99_v34 = vrot.slane %v32_v13, %v98_v26  ;;  %v110_v46 = vrot.slane %v32_v13, %v109_v37 }
  0x14   : > { %v121_v54 = vrot.slane %v32_v13, %v120_v48 }
  0x16   : > { %305 = vset.pattern.permute.xlu1 %v363_v6  ;;  %306 = vset.pattern.permute.xlu0 %v364_v7 }
  0x17   : > { %82 = vperm.xlu1 %305, %v35_v3   ;;  %93 = vperm.xlu0 %306, %v35_v3  }
  0x1b   : > { %307 = vset.pattern.permute.xlu1 %v365_v8  ;;  %309 = vset.pattern.permute.xlu0 %v366_v9 }
  0x1c   : > { %104 = vperm.xlu1 %307, %v35_v3  }
  0x20   : > { %308 = vset.pattern.permute.xlu1 %v366_v9 }
  0x21   : > { %115 = vperm.xlu1 %308, %v35_v3  }
  0x8c   : > { %v61_v17 = vpop.permute.xlu1 %60  ;;  %v39_v18 = vpop.permute.xlu0 %38 }
  0x8d   : > { %v45_v20 = vadd.f32 %v44_v14, %v39_v18  ;;  %v67_v30 = vadd.f32 %v66_v21, %v61_v17 }
  0x8f   : > { %v46_v24 = vmax.f32 %v45_v20, 0.0  ;;  %v68_v38 = vmax.f32 %v67_v30, 0.0 }
  0x91   : > { %v72_v28 = vpop.permute.xlu1 %71  ;;  %v50_v29 = vpop.permute.xlu0 %49  ;;  %v47_v31 = vadd.f32 %v46_v24, %v33_v23 }
  0x92   : > { %v56_v32 = vadd.f32 %v55_v22, %v50_v29  ;;  %v78_v35 = vadd.f32 %v77_v27, %v72_v28 }
  0x94   : > { %v57_v36 = vmax.f32 %v56_v32, 0.0  ;;  %v79_v44 = vmax.f32 %v78_v35, 0.0 }
  0x96   : > { %v58_v39 = vadd.f32 %v57_v36, %v47_v31  ;;  %v83_v40 = vpop.permute.xlu1 %82  ;;  %v94_v41 = vpop.permute.xlu0 %93 }
  0x97   : > { %v89_v42 = vadd.f32 %v88_v33, %v83_v40  ;;  %v100_v43 = vadd.f32 %v99_v34, %v94_v41 }
  0x98   : > { %v69_v45 = vadd.f32 %v68_v38, %v58_v39 }
  0x99   : > { %v90_v47 = vmax.f32 %v89_v42, 0.0  ;;  %v101_v50 = vmax.f32 %v100_v43, 0.0 }
  0x9a   : > { %v80_v49 = vadd.f32 %v79_v44, %v69_v45 }
  0x9b   : > { %v105_v51 = vpop.permute.xlu1 %104 }
  0x9c   : > { %v91_v52 = vadd.f32 %v90_v47, %v80_v49  ;;  %v111_v53 = vadd.f32 %v110_v46, %v105_v51 }
  0x9e   : > { %v102_v55 = vadd.f32 %v101_v50, %v91_v52  ;;  %v112_v56 = vmax.f32 %v111_v53, 0.0 }
  0xa0   : > { %v116_v57 = vpop.permute.xlu1 %115  ;;  %v113_v59 = vadd.f32 %v112_v56, %v102_v55 }
  0xa1   : > { %v122_v58 = vadd.f32 %v121_v54, %v116_v57  ;;  %29 = sbr.rel (!%p26_p1) target bundleno = 10 (0xa), region = 54 }
  0xa3   : > { %v123_v60 = vmax.f32 %v122_v58, 0.0 }
  0xa5   : > { %v124_v61 = vadd.f32 %v123_v60, %v113_v59 }
  0xa7   : > { %125 = vst [vmem:[#allocation4] sm:$0xff] %v124_v61 }
  0xa8 PF:  { %s126_s30 = ssub.s32 17, %s466_s0 }
  0xa9   :  { %p266_p2 = scmp.le.s32.totalorder %s126_s30, 0 }
  0xaa   :  { %s432_s7 = smov (!%p266_p2), 0  }
  0xab   :  { %261 = sbr.rel (%p266_p2) target bundleno = 337 (0x151), region = 59 }
  0xb2 LB: > { %v367_v62 = vmov 2   ;;  %v368_v63 = vmov 0   ;;  %s133_s10 = sadd.s32 %s357_s7, %s466_s0  ;;  %v369_v1 = vmov 3   ;;  %v370_v2 = vmov 1   ;;  %v137_v20 = vld [vmem:[#allocation4] sm:$0xff]  ;;  %s130_s7 = sadd.s32 1, %s357_s7   ;;  %s357_s7 = sphi %s432_s7, %s130_s7  }
  0xb3   : > { %312 = vset.pattern.permute.xlu1 %v367_v62  ;;  %310 = vset.pattern.permute.xlu0 %v368_v63  ;;  %s267_s11 = sshll.u32 %s133_s10, 3  ;;  %v371_v3 = vmov 4   ;;  %v372_v4 = vmov 5   ;;  %v373_v5 = vmov 6   ;;  %v374_v6 = vmov 7   ;;  %p129_p3 = scmp.ge.s32.totalorder %s130_s7, %s126_s30 }
  0xb4   : > { %s138_s14 = scalar_lea.vmem %s468_s2, %s267_s11  ;;  %v145_v7 = vlaneseq  ;;  %s135_s17 = scalar_lea.vmem %s469_s3, %s267_s11 }
  0xb5   : > { %v139_v0 = vld [vmem:[%s138_s14] sm:$0xff] }
  0xb6   : > { %164 = vperm.xlu1 %312, %v139_v0   ;;  %142 = vperm.xlu0 %310, %v139_v0   ;;  %v146_v8 = vshrl.u32 %v145_v7, 7  ;;  %v136_v10 = vld [vmem:[%s135_s17] sm:$0xff] }
  0xb8   : > { %v147_v9 = vsub.s32 0, %v146_v8  ;;  %v169_v12 = vsub.s32 2, %v146_v8  ;;  %v158_v13 = vsub.s32 1, %v146_v8  ;;  %v180_v16 = vsub.s32 3, %v146_v8 }
  0xb9   : > { %v191_v22 = vsub.s32 4, %v146_v8  ;;  %v202_v23 = vsub.s32 5, %v146_v8  ;;  %v213_v34 = vsub.s32 6, %v146_v8  ;;  %v224_v45 = vsub.s32 7, %v146_v8 }
  0xba   : > { %313 = vset.pattern.permute.xlu1 %v369_v1  ;;  %311 = vset.pattern.permute.xlu0 %v370_v2  ;;  %v148_v11 = vrot.slane %v136_v10, %v147_v9  ;;  %v170_v18 = vrot.slane %v136_v10, %v169_v12  ;;  %v159_v19 = vrot.slane %v136_v10, %v158_v13 }
  0xbb   : > { %175 = vperm.xlu1 %313, %v139_v0   ;;  %153 = vperm.xlu0 %311, %v139_v0   ;;  %v181_v24 = vrot.slane %v136_v10, %v180_v16  ;;  %v192_v30 = vrot.slane %v136_v10, %v191_v22  ;;  %v203_v31 = vrot.slane %v136_v10, %v202_v23 }
  0xbc   : > { %v214_v43 = vrot.slane %v136_v10, %v213_v34  ;;  %v225_v51 = vrot.slane %v136_v10, %v224_v45 }
  0xbf   : > { %314 = vset.pattern.permute.xlu1 %v371_v3  ;;  %315 = vset.pattern.permute.xlu0 %v372_v4 }
  0xc0   : > { %186 = vperm.xlu1 %314, %v139_v0   ;;  %197 = vperm.xlu0 %315, %v139_v0  }
  0xc4   : > { %316 = vset.pattern.permute.xlu1 %v373_v5  ;;  %318 = vset.pattern.permute.xlu0 %v374_v6 }
  0xc5   : > { %208 = vperm.xlu1 %316, %v139_v0  }
  0xc9   : > { %317 = vset.pattern.permute.xlu1 %v374_v6 }
  0xca   : > { %219 = vperm.xlu1 %317, %v139_v0  }
 0x135   : > { %v165_v14 = vpop.permute.xlu1 %164  ;;  %v143_v15 = vpop.permute.xlu0 %142 }
 0x136   : > { %v149_v17 = vadd.f32 %v148_v11, %v143_v15  ;;  %v171_v27 = vadd.f32 %v170_v18, %v165_v14 }
 0x138   : > { %v150_v21 = vmax.f32 %v149_v17, 0.0  ;;  %v172_v35 = vmax.f32 %v171_v27, 0.0 }
 0x13a   : > { %v176_v25 = vpop.permute.xlu1 %175  ;;  %v154_v26 = vpop.permute.xlu0 %153  ;;  %v151_v28 = vsub.f32 %v137_v20, %v150_v21 }
 0x13b   : > { %v160_v29 = vadd.f32 %v159_v19, %v154_v26  ;;  %v182_v32 = vadd.f32 %v181_v24, %v176_v25 }
 0x13d   : > { %v161_v33 = vmax.f32 %v160_v29, 0.0  ;;  %v183_v41 = vmax.f32 %v182_v32, 0.0 }
 0x13f   : > { %v162_v36 = vsub.f32 %v151_v28, %v161_v33  ;;  %v187_v37 = vpop.permute.xlu1 %186  ;;  %v198_v38 = vpop.permute.xlu0 %197 }
 0x140   : > { %v193_v39 = vadd.f32 %v192_v30, %v187_v37  ;;  %v204_v40 = vadd.f32 %v203_v31, %v198_v38 }
 0x141   : > { %v173_v42 = vsub.f32 %v162_v36, %v172_v35 }
 0x142   : > { %v194_v44 = vmax.f32 %v193_v39, 0.0  ;;  %v205_v47 = vmax.f32 %v204_v40, 0.0 }
 0x143   : > { %v184_v46 = vsub.f32 %v173_v42, %v183_v41 }
 0x144   : > { %v209_v48 = vpop.permute.xlu1 %208 }
 0x145   : > { %v195_v49 = vsub.f32 %v184_v46, %v194_v44  ;;  %v215_v50 = vadd.f32 %v214_v43, %v209_v48 }
 0x147   : > { %v206_v52 = vsub.f32 %v195_v49, %v205_v47  ;;  %v216_v53 = vmax.f32 %v215_v50, 0.0 }
 0x149   : > { %v220_v54 = vpop.permute.xlu1 %219  ;;  %v217_v56 = vsub.f32 %v206_v52, %v216_v53 }
 0x14a   : > { %v226_v55 = vadd.f32 %v225_v51, %v220_v54  ;;  %132 = sbr.rel (!%p129_p3) target bundleno = 178 (0xb2), region = 65 }
 0x14c   : > { %v227_v57 = vmax.f32 %v226_v55, 0.0 }
 0x14e   : > { %v228_v58 = vsub.f32 %v217_v56, %v227_v57 }
 0x150   : > { %229 = vst [vmem:[#allocation4] sm:$0xff] %v228_v58 }
 0x151 PF:  { %s375_s20 = smov [#allocation4]  }
 0x152   :  { %s236_s1 = sshll.u32 %s375_s20, 4  ;;  %s237_s1 = int_to_ptr.vmem [resolvable:$true] %s236_s1 }
 0x153   :  { %s319_s21 = scalar_lea.vmem %s237_s1, 128  ;;  %p324_p5 = scmp.lt.s32.totalorder %s237_s1, %s237_s1 }
 0x154   :  { %p320_p4 = scmp.ne.s32.totalorder %s237_s1, %s319_s21  ;;  %p325_p6 = scmp.lt.s32.totalorder %s319_s21, %s319_s21 }
 0x156   :  { %p326_p7 = por %p325_p6, %p324_p5 }
 0x158   :  { %p327_p8 = pnand %p326_p7, %p320_p4 }
 0x15a   :  { %330 = shalt.err (!%p327_p8)
}
 0x15b   :  { %s331_s24 = scalar_lea.hbm %s470_s4, 128 }
 0x15c   :  { %p332_p9 = scmp.ne.s32.totalorder %s470_s4, %s331_s24  ;;  %p335_p10 = scmp.lt.u32.totalorder %s331_s24, %s470_s4 }
 0x15e   :  { %p337_p11 = pnand %p335_p10, %p332_p9 }
 0x160   :  { %340 = shalt.err (!%p337_p11)
}
 0x161   :  { %239 = dma.vmem_to_hbm [thread:$0]  %s237_s1, 128, %s470_s4, [#allocation5]  }
 0x162   :  { %349 = dma.done.wait [#allocation5], 128  }
 0x163   :  { %350 = vsyncadd [#allocation5], 4294967168 }
 0x164   :  { %243 = vsyncpa [#allocation5], 1 }

</bundles_post_ra>
